<compile_context>
chip_gen: v6e
topology: v6e:2x2x1
jax: 0.10.0
libtpu: 0.0.40
codegen_flags: <defaults>
</compile_context>

<pallas_src>
import jax
import jax.numpy as jnp
from jax.experimental import pallas as pl
from jax.experimental.pallas import tpu as pltpu

_SUBLANE = 8  # f32 second-minor vreg width


def _round_up(n: int, m: int) -> int:
    return ((n + m - 1) // m) * m


def _mlp_sigmoid_kernel(x_ref, w1_ref, b1_ref, w2_ref, b2_ref, out_ref):
    # Two MXU matmuls on native-width tiles (f32 accumulation); relu on the VPU,
    # sigmoid's exp/reciprocal on the EUP (separate bundle slots).
    h = jnp.dot(x_ref[...], w1_ref[...], preferred_element_type=jnp.float32) + b1_ref[...]
    h = jnp.maximum(h, 0.0)
    y = jnp.dot(h, w2_ref[...], preferred_element_type=jnp.float32) + b2_ref[...]
    out_ref[...] = jax.nn.sigmoid(y).astype(out_ref.dtype)


def naive_classifier_forward(x, w1, b1, w2, b2, *, batch_tile=1024):
    """forward() of NaiveClassifier: {'predict': sigmoid(relu(x@W1+b1)@W2+b2)}.

    x: (B, D_in) f32; w1: (D_in, D_in); b1: (D_in,) or (1, D_in);
    w2: (D_in, D_out); b2: (D_out,) or (1, D_out).
    """
    B, D_in = x.shape
    D_out = w2.shape[1]
    b1 = jnp.asarray(b1).reshape(1, D_in)     # free metadata reshape
    b2 = jnp.asarray(b2).reshape(1, D_out)

    # batch_tile must be a multiple of the f32 sublane width for the (tb, D_in) block.
    batch_tile = max(_SUBLANE, _round_up(int(batch_tile), _SUBLANE))

    out_shape = jax.ShapeDtypeStruct((B, D_out), jnp.float32)

    if B <= batch_tile:
        # Small batch: one un-pipelined call, everything resident in VMEM at native
        # width (full-array blocks have no (8,128) divisibility constraint).
        out = pl.pallas_call(
            _mlp_sigmoid_kernel,
            out_shape=out_shape,
            in_specs=[pl.BlockSpec(memory_space=pltpu.MemorySpace.VMEM)] * 5,
            out_specs=pl.BlockSpec(memory_space=pltpu.MemorySpace.VMEM),
        )(x, w1, b1, w2, b2)
    else:
        # Large batch: tile the batch axis.  Choose an even number (>= 2) of tiles so
        # v7x's two TensorCores split the "parallel" axis, then round the tile to the
        # sublane width.  The last tile may be ragged (cdiv grid): out-of-bounds rows
        # are never written back, and rows are independent, so this is safe.
        num_tiles = max(2, pl.cdiv(B, batch_tile))
        num_tiles += num_tiles % 2
        tb = _round_up(pl.cdiv(B, num_tiles), _SUBLANE)
        grid = pl.cdiv(B, tb)

        out = pl.pallas_call(
            _mlp_sigmoid_kernel,
            out_shape=out_shape,
            grid=(grid,),
            in_specs=[
                # x streams per batch tile at its native 32-lane width.
                pl.BlockSpec((tb, D_in), lambda i: (i, 0)),
                # Weights/biases: same block every step -> VMEM-resident, fetched once.
                pl.BlockSpec((D_in, D_in), lambda i: (0, 0)),
                pl.BlockSpec((1, D_in), lambda i: (0, 0)),
                pl.BlockSpec((D_in, D_out), lambda i: (0, 0)),
                pl.BlockSpec((1, D_out), lambda i: (0, 0)),
            ],
            # Native-width output block: last dim equals the full array dim.
            out_specs=pl.BlockSpec((tb, D_out), lambda i: (i, 0)),
            compiler_params=pltpu.CompilerParams(
                # Batch tiles are independent -> v7x's 2 TCs split them.
                dimension_semantics=("parallel",),
            ),
        )(x, w1, b1, w2, b2)

    return {"predict": out}


def naive_classifier_predict(x, w1, b1, w2, b2, **kw):
    """predict() of NaiveClassifier: sigmoid(mlp(x)) > 0.5."""
    return {"predict": naive_classifier_forward(x, w1, b1, w2, b2, **kw)["predict"] > 0.5}


if __name__ == "__main__":
    # Shapes consistent with the module: in_feature_dim=32, out_feature_dim=16, batch=8.
    B, D_IN, D_OUT = 8, 32, 16

    key = jax.random.PRNGKey(0)
    kx, k1, kb1, k2, kb2, kx2 = jax.random.split(key, 6)

    x = jax.random.normal(kx, (B, D_IN), dtype=jnp.float32)

    # Deterministic parameter init (uniform, roughly torch Linear's default scale).
    lim = 1.0 / jnp.sqrt(D_IN)
    w1 = jax.random.uniform(k1, (D_IN, D_IN), minval=-lim, maxval=lim, dtype=jnp.float32)
    b1 = jax.random.uniform(kb1, (1, D_IN), minval=-lim, maxval=lim, dtype=jnp.float32)
    w2 = jax.random.uniform(k2, (D_IN, D_OUT), minval=-lim, maxval=lim, dtype=jnp.float32)
    b2 = jax.random.uniform(kb2, (1, D_OUT), minval=-lim, maxval=lim, dtype=jnp.float32)

    def ref_forward(xi):
        h = jnp.maximum(xi @ w1 + b1, 0.0)
        return jax.nn.sigmoid(h @ w2 + b2)

    # Path 1: small batch -> single un-pipelined call, native-width output (no pad/slice).
    y = jax.block_until_ready(naive_classifier_forward(x, w1, b1, w2, b2)["predict"])
    assert y.shape == (B, D_OUT) and y.dtype == jnp.float32
    assert jnp.allclose(y, ref_forward(x), atol=1e-5, rtol=1e-5)

    # Path 1b: small batch not a multiple of the sublane width (no wrapper padding).
    y_odd = jax.block_until_ready(
        naive_classifier_forward(x[:5], w1, b1, w2, b2)["predict"])
    assert y_odd.shape == (5, D_OUT)
    assert jnp.allclose(y_odd, ref_forward(x[:5]), atol=1e-5, rtol=1e-5)

    # Path 2: batch-tiled "parallel" grid with VMEM-resident weights.  B2=602 with
    # batch_tile=256 -> 4 tiles of 152 rows, ragged last tile (146 valid rows) and a
    # batch that is not a multiple of 8 -- exercises the cdiv / edge-masking path.
    # (batch_tile is shrunk here only to keep the correctness test small; production
    # calls should use the default 1024.)
    B2 = 602
    x2 = jax.random.normal(kx2, (B2, D_IN), dtype=jnp.float32)
    y2 = jax.block_until_ready(
        naive_classifier_forward(x2, w1, b1, w2, b2, batch_tile=256)["predict"])
    assert y2.shape == (B2, D_OUT)
    assert jnp.allclose(y2, ref_forward(x2), atol=1e-5, rtol=1e-5)

    # predict(): thresholded output.
    p = jax.block_until_ready(naive_classifier_predict(x, w1, b1, w2, b2)["predict"])
    assert p.shape == (B, D_OUT) and p.dtype == jnp.bool_
    assert jnp.array_equal(p, y > 0.5)

    print("KERNEL_OK")
</pallas_src>

<mosaic_0001>
module attributes {stable_mosaic.version = 11 : i64} {
  func.func @_mlp_sigmoid_kernel(%arg0: memref<8x32xf32, #tpu.memory_space<vmem>>, %arg1: memref<32x32xf32, #tpu.memory_space<vmem>>, %arg2: memref<1x32xf32, #tpu.memory_space<vmem>>, %arg3: memref<32x16xf32, #tpu.memory_space<vmem>>, %arg4: memref<1x16xf32, #tpu.memory_space<vmem>>, %arg5: memref<8x16xf32, #tpu.memory_space<vmem>>) attributes {dimension_semantics = [], scalar_prefetch = 0 : i64, scratch_operands = 0 : i64, tpu.core_type = #tpu.core_type<tc>} {
    %c0 = arith.constant 0 : index
    %c0_0 = arith.constant 0 : index
    %0 = vector.load %arg0[%c0, %c0_0] : memref<8x32xf32, #tpu.memory_space<vmem>>, vector<8x32xf32>
    %c0_1 = arith.constant 0 : index
    %c0_2 = arith.constant 0 : index
    %1 = vector.load %arg1[%c0_1, %c0_2] : memref<32x32xf32, #tpu.memory_space<vmem>>, vector<32x32xf32>
    %cst = arith.constant dense<0.000000e+00> : vector<8x32xf32>
    %2 = tpu.matmul %0, %1, %cst {dimension_numbers = #tpu.dot_dimension_numbers<[1], [0], [0], [1], [0, 0, 1, 1], [], []>} : vector<8x32xf32>, vector<32x32xf32>, vector<8x32xf32> -> vector<8x32xf32>
    %c0_3 = arith.constant 0 : index
    %c0_4 = arith.constant 0 : index
    %3 = vector.load %arg2[%c0_3, %c0_4] : memref<1x32xf32, #tpu.memory_space<vmem>>, vector<1x32xf32>
    %4 = vector.broadcast %3 : vector<1x32xf32> to vector<8x32xf32>
    %5 = arith.addf %2, %4 : vector<8x32xf32>
    %cst_5 = arith.constant 0.000000e+00 : f32
    %6 = vector.broadcast %cst_5 : f32 to vector<8x32xf32>
    %7 = arith.maximumf %5, %6 : vector<8x32xf32>
    %c0_6 = arith.constant 0 : index
    %c0_7 = arith.constant 0 : index
    %8 = vector.load %arg3[%c0_6, %c0_7] : memref<32x16xf32, #tpu.memory_space<vmem>>, vector<32x16xf32>
    %cst_8 = arith.constant dense<0.000000e+00> : vector<8x16xf32>
    %9 = tpu.matmul %7, %8, %cst_8 {dimension_numbers = #tpu.dot_dimension_numbers<[1], [0], [0], [1], [0, 0, 1, 1], [], []>} : vector<8x32xf32>, vector<32x16xf32>, vector<8x16xf32> -> vector<8x16xf32>
    %c0_9 = arith.constant 0 : index
    %c0_10 = arith.constant 0 : index
    %10 = vector.load %arg4[%c0_9, %c0_10] : memref<1x16xf32, #tpu.memory_space<vmem>>, vector<1x16xf32>
    %11 = vector.broadcast %10 : vector<1x16xf32> to vector<8x16xf32>
    %12 = arith.addf %9, %11 : vector<8x16xf32>
    %13 = arith.negf %12 : vector<8x16xf32>
    %14 = math.exp %13 : vector<8x16xf32>
    %cst_11 = arith.constant 1.000000e+00 : f32
    %15 = vector.broadcast %cst_11 : f32 to vector<8x16xf32>
    %16 = arith.addf %15, %14 : vector<8x16xf32>
    %17 = arith.divf %15, %16 : vector<8x16xf32>
    %c0_12 = arith.constant 0 : index
    %c0_13 = arith.constant 0 : index
    %18 = vector.load %arg5[%c0_12, %c0_13] : memref<8x16xf32, #tpu.memory_space<vmem>>, vector<8x16xf32>
    tpu.vector_store %arg5[%c0_12, %c0_13], %17 {strides = array<i32>} : memref<8x16xf32, #tpu.memory_space<vmem>>, vector<8x16xf32>,
    return
  }
}

</mosaic_0001>

<bundles_post_ra>
// kernel: tpu_custom_call.1
= control target key start
LH: loop header
LB: loop body
LE: loop exit
PB: predicated region body
PF: predicated region fallthrough
CT: control target
= control target key end

     0   :  { %v280_v1 = vmov 0.0   ;;  %vm281_vm0 = vmmov 0   ;;  %s351_s0 = inlined_call_operand.vmem [shape: f32[8,32], index: 0, kind: input, shape index: {}]   ;;  %s352_s1 = inlined_call_operand.vmem [shape: f32[32,32], index: 1, kind: input, shape index: {}]   ;;  %s353_s2 = inlined_call_operand.vmem [shape: f32[1,32], index: 2, kind: input, shape index: {}]   ;;  %s354_s3 = inlined_call_operand.vmem [shape: f32[32,16], index: 3, kind: input, shape index: {}]   ;;  %s355_s4 = inlined_call_operand.vmem [shape: f32[1,16], index: 4, kind: input, shape index: {}]   ;;  %s356_s5 = inlined_call_operand.hbm [shape: f32[8,16], index: 5, kind: output, shape index: {}]  }
   0x1   :  { %v25_v0 = vld [vmem:[%s352_s1 + $0x18] sm:$0xff]  ;;  %229 = vmatprep.subr.mxu0 %v280_v1  ;;  %v24_v2 = vld [vmem:[%s352_s1 + $0x10] sm:$0xff]  ;;  %237 = vmatprep.mubr.msk.f32.mxu0 %vm281_vm0, %v280_v1 }
   0x2   :  { %v111_v3 = vld [vmem:[%s354_s3 + $0x18] sm:$0xff]  ;;  %230 = vmatpush3.msra.mxu0 %v25_v0  ;;  %240 = vmatprep.subr.mxu1 %v280_v1 }
   0x3   :  { %10 = vsyncpa [#allocation3], 0  ;;  %231 = vmatprep.subr.mxu0 %v280_v1  ;;  %v23_v4 = vld [vmem:[%s352_s1 + $0x8] sm:$0xff]  ;;  %241 = vmatpush3.msra.mxu1 %v111_v3  ;;  %v22_v5 = vld [vmem:[%s352_s1] sm:$0xff]  ;;  %vm33_vm1 = vcmask 261120   ;;  %vm198_vm2 = vcmask 130048  }
   0x4   :  { %232 = vmatpush3.msra.mxu0 %v24_v2  ;;  %242 = vmatprep.subr.mxu1 %v280_v1  ;;  %v21_v6 = vld [vmem:[%s351_s0] sm:$0xff]  ;;  %v110_v7 = vld [vmem:[%s354_s3 + $0x10] sm:$0xff]  ;;  %v109_v8 = vld [vmem:[%s354_s3 + $0x8] sm:$0xff] }
   0x5   :  { %233 = vmatprep.subr.mxu0 %v280_v1  ;;  %248 = vmatprep.mubr.msk.f32.mxu1 %vm281_vm0, %v280_v1  ;;  %v108_v9 = vld [vmem:[%s354_s3] sm:$0xff]  ;;  %s282_s3 = smov [#allocation2]  }
   0x6   :  { %234 = vmatpush3.msra.mxu0 %v23_v4  ;;  %243 = vmatpush3.msra.mxu1 %v110_v7  ;;  %v214_v10 = vld [vmem:[%s353_s2] ss:$0 sm:$0xff]  ;;  %s206_s2 = sshll.u32 %s282_s3, 4  ;;  %s207_s2 = int_to_ptr.vmem [resolvable:$true] %s206_s2 }
   0x7   :  { %235 = vmatprep.subr.mxu0 %v280_v1  ;;  %244 = vmatprep.subr.mxu1 %v280_v1  ;;  %v216_v15 = vld [vmem:[%s355_s4] ss:$0 sm:$0xff]  ;;  %s258_s13 = scalar_lea.vmem %s207_s2, 128  ;;  %p263_p1 = scmp.lt.s32.totalorder %s207_s2, %s207_s2 }
   0x8   :  { %236 = vmatpush3.msra.mxu0 %v22_v5  ;;  %245 = vmatpush3.msra.mxu1 %v109_v8  ;;  %p259_p0 = scmp.ne.s32.totalorder %s207_s2, %s258_s13  ;;  %p264_p2 = scmp.lt.s32.totalorder %s258_s13, %s258_s13 }
   0x9   :  { %238 = vmatmul.mubr.msk.f32.vlgmr.msra.gmra.mxu0 %vm33_vm1, %v21_v6  ;;  %246 = vmatprep.subr.mxu1 %v280_v1 }
   0xa   :  { %247 = vmatpush3.msra.mxu1 %v108_v9  ;;  %p265_p3 = por %p264_p2, %p263_p1 }
   0xc   :  { %p266_p4 = pnand %p265_p3, %p259_p0 }
  0xc9   :  { %v103_v11 = vpop.f32.mrf.mxu0 }
  0xca   :  { %v104_v12 = vadd.f32 %v214_v10, %v103_v11 }
  0xcb   :  { %v239_v13 = vpop.f32.mrf.mxu0 }
  0xcc   :  { %v107_v14 = vmax.f32 %v104_v12, 0.0 }
  0xce   :  { %249 = vmatmul.mubr.msk.f32.vlgmr.msra.gmra.mxu1 %vm33_vm1, %v107_v14 }
 0x18e   :  { %v188_v16 = vpop.f32.mrf.mxu1 }
 0x18f   :  { %v189_v17 = vadd.f32 %v216_v15, %v188_v16 }
 0x190   :  { %v250_v18 = vpop.f32.mrf.mxu1 }
 0x191   :  { %v218_v19 = vmul.f32 -1.442695, %v189_v17 }
 0x193   :  { %254 = vpow2.f32 %v218_v19 }
 0x1a0   :  { %v255_v20 = vpop.eup %254 }
 0x1a1   :  { %v195_v21 = vadd.f32 1.0, %v255_v20 }
 0x1a3   :  { %256 = vrcp.f32 %v195_v21 }
 0x1b0   :  { %v257_v22 = vpop.eup %256 }
 0x1b1   :  { %199 = vst.msk [vmem:[#allocation2] sm:$0xff] %vm198_vm2, %v257_v22 }
 0x1b2   :  { %269 = shalt.err (!%p266_p4)
}
 0x1b3   :  { %209 = dma.vmem_to_hbm [thread:$0]  %s207_s2, 128, %s356_s5, [#allocation3]  }
 0x1b4   :  { %278 = dma.done.wait [#allocation3], 128  }
 0x1b5   :  { %279 = vsyncadd [#allocation3], 4294967168 }
 0x1b6   :  { %213 = vsyncpa [#allocation3], 1 }

</bundles_post_ra>
